<compile_context>
chip_gen: v7x
topology: tpu7x:2x2x1
jax: 0.10.0
libtpu: 0.0.40
codegen_flags: <defaults>
</compile_context>

<pallas_src>
import jax
import jax.numpy as jnp
from jax.experimental import pallas as pl
from jax.experimental.pallas import tpu as pltpu


def _conv3x3_kernel(x_ref, w_ref, b_ref, o_ref):
    # x_ref: (N*H, 3*W*Cin)   dy-im2row rows (three row-shifted views concat'd)
    # w_ref: (3*W*Cin, W*Cout) banded weights (horizontal taps + L/R zero pad
    #                          folded in; dy-major to match x_ref's concat order)
    # b_ref: (1, W*Cout)       bias tiled over W
    # o_ref: (N*H, W*Cout)     lane-dense output
    acc = jnp.dot(x_ref[...], w_ref[...], preferred_element_type=jnp.float32)
    o_ref[...] = (acc + b_ref[...].astype(jnp.float32)).astype(o_ref.dtype)


def ctmo_forward(x_nchw, weight_oihw, bias):
    """x_nchw: (N, Cin, H, W). weight_oihw: (Cout, Cin, 3, 3). bias: (Cout,)."""
    N, Cin, H, W = x_nchw.shape
    Cout = weight_oihw.shape[0]
    WCin = W * Cin
    WCout = W * Cout
    K = 3 * WCin

    # ---- glue (plain JAX, fused by XLA with the layout change) --------------
    # NCHW -> NHWC -> (N, H, W*Cin); pad one zero row top/bottom (vertical
    # halo); concatenate the three dy-shifted views along the last axis to
    # form the dy-im2row; flatten rows.
    x_rows = jnp.transpose(x_nchw, (0, 2, 3, 1)).reshape(N, H, WCin)
    xh = jnp.pad(x_rows, ((0, 0), (1, 1), (0, 0)))               # (N, H+2, WCin)
    x_im2row = jnp.concatenate([xh[:, dy:dy + H, :] for dy in range(3)],
                               axis=-1)                          # (N, H, 3*WCin)
    x2d = x_im2row.reshape(N * H, K)                             # (N*H, 3*WCin)

    # ---- banded weight matrix (one-time weight transform) -------------------
    # B[dy, wcol*Cin+ci, w*Cout+co] = weight[co, ci, dy, wcol - w + 1]
    # (zero when the horizontal tap falls outside 0..2, which also encodes the
    #  left/right zero padding).  Flattened dy-major to match x2d's layout.
    wk = jnp.transpose(weight_oihw, (2, 3, 1, 0))                # (3,3,Cin,Cout) [dy,dx,ci,co]
    shift = jnp.stack(
        [jnp.eye(W, dtype=wk.dtype, k=1 - dx) for dx in range(3)], axis=0
    )                                                            # (3, W, W) [dx, wcol, w]
    bw = jnp.einsum("xuw,yxio->yuiwo", shift, wk)                # (3, W, Cin, W, Cout)
    bw = bw.reshape(K, WCout)                                    # (3*W*Cin, W*Cout)

    b_tiled = jnp.tile(bias, W).reshape(1, WCout)                # (1, W*Cout)

    out2d = pl.pallas_call(
        _conv3x3_kernel,
        out_shape=jax.ShapeDtypeStruct((N * H, WCout), x_nchw.dtype),
        grid=(1,),
        in_specs=[
            pl.BlockSpec((N * H, K), lambda i: (0, 0)),
            pl.BlockSpec((K, WCout), lambda i: (0, 0)),
            pl.BlockSpec((1, WCout), lambda i: (0, 0)),
        ],
        out_specs=pl.BlockSpec((N * H, WCout), lambda i: (0, 0)),
        compiler_params=pltpu.CompilerParams(
            dimension_semantics=("arbitrary",)),
    )(x2d, bw, b_tiled)

    # back to PyTorch NCHW convention (kept inside the same jit for fusion)
    return jnp.transpose(out2d.reshape(N, H, W, Cout), (0, 3, 1, 2))


if __name__ == "__main__":
    # Small shapes consistent with the module: N=2, in_ch=4, out_ch=8, 16x16.
    N, Cin, Cout, H, W = 2, 4, 8, 16, 16

    key = jax.random.PRNGKey(0)
    kx, kw, kb = jax.random.split(key, 3)

    x = jax.random.normal(kx, (N, Cin, H, W), dtype=jnp.float32)
    # Deterministic param init (uniform in +-1/sqrt(fan_in), like nn.Conv2d).
    fan_in = Cin * 3 * 3
    bound = 1.0 / (fan_in ** 0.5)
    weight = jax.random.uniform(kw, (Cout, Cin, 3, 3), jnp.float32,
                                minval=-bound, maxval=bound)
    bias = jax.random.uniform(kb, (Cout,), jnp.float32,
                              minval=-bound, maxval=bound)

    fwd = jax.jit(ctmo_forward)  # fuse the wrapper-side layout glue
    out = fwd(x, weight, bias)
    out = jax.block_until_ready(out)

    # Reference check against XLA's conv (same semantics as PyTorch Conv2d
    # preceded by ZeroPad2d(1)).
    ref = jax.lax.conv_general_dilated(
        x, weight, window_strides=(1, 1), padding=((1, 1), (1, 1)),
        dimension_numbers=("NCHW", "OIHW", "NCHW"),
    ) + bias.reshape(1, Cout, 1, 1)
    assert out.shape == (N, Cout, H, W)
    assert jnp.allclose(out, ref, atol=1e-4, rtol=1e-4)

    print("KERNEL_OK")
</pallas_src>

<mosaic_0001>
module attributes {stable_mosaic.version = 11 : i64} {
  func.func @_conv3x3_kernel(%arg0: i32, %arg1: memref<32x192xf32, #tpu.memory_space<vmem>>, %arg2: memref<192x128xf32, #tpu.memory_space<vmem>>, %arg3: memref<1x128xf32, #tpu.memory_space<vmem>>, %arg4: memref<32x128xf32, #tpu.memory_space<vmem>>) attributes {dimension_semantics = [#tpu.dimension_semantics<arbitrary>], iteration_bounds = array<i64: 1>, scalar_prefetch = 0 : i64, scratch_operands = 0 : i64, tpu.core_type = #tpu.core_type<tc>, window_params = [{pipeline_mode = #tpu.pipeline_mode<synchronous>, transform_indices = @transform_0, window_bounds = array<i64: 32, 192>}, {pipeline_mode = #tpu.pipeline_mode<synchronous>, transform_indices = @transform_1, window_bounds = array<i64: 192, 128>}, {pipeline_mode = #tpu.pipeline_mode<synchronous>, transform_indices = @transform_2, window_bounds = array<i64: 1, 128>}, {pipeline_mode = #tpu.pipeline_mode<synchronous>, transform_indices = @transform_3, window_bounds = array<i64: 32, 128>}]} {
    %c0 = arith.constant 0 : index
    %c0_0 = arith.constant 0 : index
    %0 = vector.load %arg1[%c0, %c0_0] : memref<32x192xf32, #tpu.memory_space<vmem>>, vector<32x192xf32>
    %c0_1 = arith.constant 0 : index
    %c0_2 = arith.constant 0 : index
    %1 = vector.load %arg2[%c0_1, %c0_2] : memref<192x128xf32, #tpu.memory_space<vmem>>, vector<192x128xf32>
    %cst = arith.constant dense<0.000000e+00> : vector<32x128xf32>
    %2 = tpu.matmul %0, %1, %cst {dimension_numbers = #tpu.dot_dimension_numbers<[1], [0], [0], [1], [0, 0, 1, 1], [], []>} : vector<32x192xf32>, vector<192x128xf32>, vector<32x128xf32> -> vector<32x128xf32>
    %c0_3 = arith.constant 0 : index
    %c0_4 = arith.constant 0 : index
    %3 = vector.load %arg3[%c0_3, %c0_4] : memref<1x128xf32, #tpu.memory_space<vmem>>, vector<1x128xf32>
    %4 = vector.broadcast %3 : vector<1x128xf32> to vector<32x128xf32>
    %5 = arith.addf %2, %4 : vector<32x128xf32>
    %c0_5 = arith.constant 0 : index
    %c0_6 = arith.constant 0 : index
    %6 = vector.load %arg4[%c0_5, %c0_6] : memref<32x128xf32, #tpu.memory_space<vmem>>, vector<32x128xf32>
    tpu.vector_store %arg4[%c0_5, %c0_6], %5 {strides = array<i32>} : memref<32x128xf32, #tpu.memory_space<vmem>>, vector<32x128xf32>,
    return
  }
  func.func @transform_0(%arg0: i32) -> (i32, i32) {
    %c0_i32 = arith.constant 0 : i32
    %c0_i32_0 = arith.constant 0 : i32
    %c0_i32_1 = arith.constant 0 : i32
    return %c0_i32, %c0_i32_0 : i32, i32
  }
  func.func @transform_1(%arg0: i32) -> (i32, i32) {
    %c0_i32 = arith.constant 0 : i32
    %c0_i32_0 = arith.constant 0 : i32
    %c0_i32_1 = arith.constant 0 : i32
    return %c0_i32, %c0_i32_0 : i32, i32
  }
  func.func @transform_2(%arg0: i32) -> (i32, i32) {
    %c0_i32 = arith.constant 0 : i32
    %c0_i32_0 = arith.constant 0 : i32
    %c0_i32_1 = arith.constant 0 : i32
    return %c0_i32, %c0_i32_0 : i32, i32
  }
  func.func @transform_3(%arg0: i32) -> (i32, i32) {
    %c0_i32 = arith.constant 0 : i32
    %c0_i32_0 = arith.constant 0 : i32
    %c0_i32_1 = arith.constant 0 : i32
    return %c0_i32, %c0_i32_0 : i32, i32
  }
}

</mosaic_0001>

<bundles_post_ra>
// kernel: tile.8
= control target key start
LH: loop header
LB: loop body
LE: loop exit
PB: predicated region body
PF: predicated region fallthrough
CT: control target
= control target key end

     0   :  { %s28_s0 = inlined_call_operand.vmem [shape: f32[8], index: 0, kind: input, shape index: {}]   ;;  %s29_s1 = inlined_call_operand.vmem [shape: f32[16,8], index: 1, kind: output, shape index: {}]  }
   0x1   :  { %v4_v0 = vld [vmem:[%s28_s0] ss:$0 sm:$0xff] }
   0x2   :  { %5 = vst [vmem:[%s29_s1] sm:$0xff] %v4_v0  ;;  %8 = vst [vmem:[%s29_s1 + $0x8] sm:$0xff] %v4_v0 }

// kernel: tile.9
= control target key start
LH: loop header
LB: loop body
LE: loop exit
PB: predicated region body
PF: predicated region fallthrough
CT: control target
= control target key end

     0   :  { %s131_s10 = smov 120   ;;  %s132_s11 = smov 104   ;;  %vm3_vm0 = vcmask 64512   ;;  %vm9_vm1 = vcmask 1048512   ;;  %vm15_vm2 = vcmask 982912   ;;  %vm21_vm3 = vcmask 917312   ;;  %s207_s0 = inlined_call_operand.vmem [shape: f32[16,8], index: 0, kind: input, shape index: {}]   ;;  %s208_s1 = inlined_call_operand.vmem [shape: f32[1,128], index: 1, kind: output, shape index: {}]  }
   0x1   :  { %v101_v0 = vld [vmem:[%s207_s0 + $0xf] sm:$0x1]   ;;  %v103_v1 = vld [vmem:[%s207_s0 + $0xd] sm:$0x1]   ;;  %v102_v2 = vld [vmem:[%s207_s0 + $0xe] sm:$0x1]  }
   0x2   :  { %7 = vrot.lane.b32.xlu0 %v101_v0, %s131_s10  ;;  %19 = vrot.lane.b32.xlu1 %v103_v1, %s132_s11  ;;  %v104_v3 = vld [vmem:[%s207_s0 + $0xc] sm:$0x1]   ;;  %s133_s16 = smov 112   ;;  %s134_s17 = smov 96   ;;  %v105_v4 = vld [vmem:[%s207_s0 + $0xb] sm:$0x1]  }
   0x3   :  { %v106_v5 = vld [vmem:[%s207_s0 + $0xa] sm:$0x1]   ;;  %v2_v6 = vld [vmem:[%s207_s0] sm:$0x1]   ;;  %s135_s24 = smov 88   ;;  %s136_s25 = smov 80  }
   0x4   :  { %4 = vst.msk [vmem:[#allocation0] sm:$0x1] %vm3_vm0, %v2_v6   ;;  %v107_v7 = vld [vmem:[%s207_s0 + $0x9] sm:$0x1]   ;;  %v108_v8 = vld [vmem:[%s207_s0 + $0x8] sm:$0x1]  }
   0x5   :  { %s137_s30 = smov 72   ;;  %s138_s2 = smov 64   ;;  %v109_v9 = vld [vmem:[%s207_s0 + $0x7] sm:$0x1]   ;;  %v110_v10 = vld [vmem:[%s207_s0 + $0x6] sm:$0x1]  }
   0x6   :  { %13 = vrot.lane.b32.xlu0 %v102_v2, %s133_s16  ;;  %25 = vrot.lane.b32.xlu1 %v104_v3, %s134_s17  ;;  %s139_s7 = smov 56   ;;  %s140_s8 = smov 48   ;;  %v111_v11 = vld [vmem:[%s207_s0 + $0x5] sm:$0x1]   ;;  %v112_v12 = vld [vmem:[%s207_s0 + $0x4] sm:$0x1]  }
   0x7   :  { %s141_s13 = smov 40   ;;  %s142_s14 = smov 32   ;;  %v113_v13 = vld [vmem:[%s207_s0 + $0x3] sm:$0x1]   ;;  %v114_v14 = vld [vmem:[%s207_s0 + $0x2] sm:$0x1]  }
   0x8   :  { %s143_s19 = smov 24   ;;  %s144_s20 = smov 16   ;;  %v115_v15 = vld [vmem:[%s207_s0 + $0x1] sm:$0x1]   ;;  %vm27_vm4 = vcmask 851712   ;;  %vm33_vm5 = vcmask 786112  }
   0x9   :  { %s145_s0 = smov 8   ;;  %vm39_vm6 = vcmask 720512   ;;  %vm45_vm7 = vcmask 654912   ;;  %vm51_vm8 = vcmask 589312   ;;  %vm57_vm9 = vcmask 523712  }
   0xa   :  { %31 = vrot.lane.b32.xlu0 %v105_v4, %s135_s24  ;;  %37 = vrot.lane.b32.xlu1 %v106_v5, %s136_s25  ;;  %vm63_vm10 = vcmask 458112   ;;  %vm69_vm11 = vcmask 392512   ;;  %vm75_vm12 = vcmask 326912   ;;  %vm81_vm13 = vcmask 261312  }
   0xb   :  { %vm87_vm14 = vcmask 195712   ;;  %vm93_vm15 = vcmask 130112  }
   0xe   :  { %43 = vrot.lane.b32.xlu0 %v107_v7, %s137_s30  ;;  %49 = vrot.lane.b32.xlu1 %v108_v8, %s138_s2 }
  0x12   :  { %55 = vrot.lane.b32.xlu0 %v109_v9, %s139_s7  ;;  %61 = vrot.lane.b32.xlu1 %v110_v10, %s140_s8 }
  0x16   :  { %67 = vrot.lane.b32.xlu0 %v111_v11, %s141_s13  ;;  %73 = vrot.lane.b32.xlu1 %v112_v12, %s142_s14 }
  0x1a   :  { %79 = vrot.lane.b32.xlu0 %v113_v13, %s143_s19  ;;  %85 = vrot.lane.b32.xlu1 %v114_v14, %s144_s20 }
  0x1e   :  { %91 = vrot.lane.b32.xlu0 %v115_v15, %s145_s0 }
  0x74   :  { %v8_v16 = vpop.permute.xlu0 %7   ;;  %v20_v17 = vpop.permute.xlu1 %19  }
  0x75   :  { %10 = vst.msk [vmem:[#allocation0] sm:$0x1] %vm9_vm1, %v8_v16  }
  0x78   :  { %v14_v18 = vpop.permute.xlu0 %13   ;;  %v26_v19 = vpop.permute.xlu1 %25  }
  0x79   :  { %16 = vst.msk [vmem:[#allocation0] sm:$0x1] %vm15_vm2, %v14_v18  }
  0x7a   :  { %22 = vst.msk [vmem:[#allocation0] sm:$0x1] %vm21_vm3, %v20_v17  }
  0x7b   :  { %28 = vst.msk [vmem:[#allocation0] sm:$0x1] %vm27_vm4, %v26_v19  }
  0x7c   :  { %v32_v20 = vpop.permute.xlu0 %31   ;;  %v38_v21 = vpop.permute.xlu1 %37  }
  0x7d   :  { %34 = vst.msk [vmem:[#allocation0] sm:$0x1] %vm33_vm5, %v32_v20  }
  0x7e   :  { %40 = vst.msk [vmem:[#allocation0] sm:$0x1] %vm39_vm6, %v38_v21  }
  0x80   :  { %v44_v22 = vpop.permute.xlu0 %43   ;;  %v50_v23 = vpop.permute.xlu1 %49  }
  0x81   :  { %46 = vst.msk [vmem:[#allocation0] sm:$0x1] %vm45_vm7, %v44_v22  }
  0x82   :  { %52 = vst.msk [vmem:[#allocation0] sm:$0x1] %vm51_vm8, %v50_v23  }
  0x84   :  { %v56_v24 = vpop.permute.xlu0 %55   ;;  %v62_v25 = vpop.permute.xlu1 %61  }
  0x85   :  { %58 = vst.msk [vmem:[#allocation0] sm:$0x1] %vm57_vm9, %v56_v24  }
  0x86   :  { %64 = vst.msk [vmem:[#allocation0] sm:$0x1] %vm63_vm10, %v62_v25  }
  0x88   :  { %v68_v26 = vpop.permute.xlu0 %67   ;;  %v74_v27 = vpop.permute.xlu1 %73  }
  0x89   :  { %70 = vst.msk [vmem:[#allocation0] sm:$0x1] %vm69_vm11, %v68_v26  }
  0x8a   :  { %76 = vst.msk [vmem:[#allocation0] sm:$0x1] %vm75_vm12, %v74_v27  }
  0x8c   :  { %v80_v28 = vpop.permute.xlu0 %79   ;;  %v86_v29 = vpop.permute.xlu1 %85  }
  0x8d   :  { %82 = vst.msk [vmem:[#allocation0] sm:$0x1] %vm81_vm13, %v80_v28  }
  0x8e   :  { %88 = vst.msk [vmem:[#allocation0] sm:$0x1] %vm87_vm14, %v86_v29  }
  0x90   :  { %v92_v30 = vpop.permute.xlu0 %91  }
  0x91   :  { %94 = vst.msk [vmem:[#allocation0] sm:$0x1] %vm93_vm15, %v92_v30  }
  0x98   :  { %v98_v31 = vld [vmem:[#allocation0] sm:$0x1] }
  0x99   :  { %100 = vst [vmem:[%s208_s1] sm:$0x1] %v98_v31 }

// kernel: ctmo_forward.1
= control target key start
LH: loop header
LB: loop body
LE: loop exit
PB: predicated region body
PF: predicated region fallthrough
CT: control target
= control target key end

     0   :  { %v225_v0 = vmov 0.0|0.0   ;;  %vm53_vm0 = vcmask 523264   ;;  %s385_s1 = inlined_call_operand.vmem [shape: f32[192,128], index: 1, kind: input, shape index: {}]   ;;  %s386_s0 = inlined_call_operand.vmem [shape: f32[32,192], index: 0, kind: input, shape index: {}]   ;;  %s387_s2 = inlined_call_operand.vmem [shape: f32[1,128], index: 2, kind: input, shape index: {}]   ;;  %s388_s3 = inlined_call_operand.vmem [shape: f32[32,128], index: 3, kind: output, shape index: {}]  }
   0x1   :  { %164 = vmatprep.subr.bf16.mxu0 %v225_v0  ;;  %200 = vmatprep.subr.bf16.mxu1 %v225_v0  ;;  %v22_v1 = vld [vmem:[%s385_s1] sm:$0xff]  ;;  %v23_v2 = vld [vmem:[%s385_s1 + $0x8] sm:$0xff]  ;;  %v24_v3 = vld [vmem:[%s385_s1 + $0x10] sm:$0xff] }
   0x2   :  { %v165_v4 = vpack.c.bf16 %v23_v2, %v22_v1  ;;  %v25_v5 = vld [vmem:[%s385_s1 + $0x18] sm:$0xff]  ;;  %v26_v7 = vld [vmem:[%s385_s1 + $0x20] sm:$0xff]  ;;  %v27_v8 = vld [vmem:[%s385_s1 + $0x28] sm:$0xff] }
   0x3   :  { %v168_v6 = vpack.c.bf16 %v25_v5, %v24_v3  ;;  %v171_v9 = vpack.c.bf16 %v27_v8, %v26_v7  ;;  %v28_v10 = vld [vmem:[%s385_s1 + $0x30] sm:$0xff]  ;;  %v29_v11 = vld [vmem:[%s385_s1 + $0x38] sm:$0xff]  ;;  %v15_v12 = vld [vmem:[%s386_s0 + $0x8] sm:$0xff] }
   0x4   :  { %166 = vmatpush1.bf16.msra.mxu0 %v165_v4  ;;  %212 = vmatpush1.bf16.msra.mxu1 %v165_v4  ;;  %v19_v13 = vld [vmem:[%s386_s0 + $0x28] sm:$0xff]  ;;  %v174_v14 = vpack.c.bf16 %v29_v11, %v28_v10  ;;  %v30_v15 = vld [vmem:[%s385_s1 + $0x40] sm:$0xff]  ;;  %v32_v18 = vld [vmem:[%s385_s1 + $0x50] sm:$0xff] }
   0x5   :  { %167 = vmatprep.subr.bf16.mxu0 %v225_v0  ;;  %201 = vmatprep.subr.bf16.mxu1 %v225_v0  ;;  %v31_v16 = vld [vmem:[%s385_s1 + $0x48] sm:$0xff]  ;;  %v33_v19 = vld [vmem:[%s385_s1 + $0x58] sm:$0xff]  ;;  %v34_v21 = vld [vmem:[%s385_s1 + $0x60] sm:$0xff] }
   0x6   :  { %160 = vmatprep.mubr.msk.f32.mxu0 %vm53_vm0, %v15_v12  ;;  %162 = vmatprep.mubr.msk.f32.mxu1 %vm53_vm0, %v19_v13  ;;  %v177_v17 = vpack.c.bf16 %v31_v16, %v30_v15  ;;  %v180_v20 = vpack.c.bf16 %v33_v19, %v32_v18  ;;  %v35_v22 = vld [vmem:[%s385_s1 + $0x68] sm:$0xff]  ;;  %v36_v24 = vld [vmem:[%s385_s1 + $0x70] sm:$0xff]  ;;  %v37_v25 = vld [vmem:[%s385_s1 + $0x78] sm:$0xff] }
   0x7   :  { %v183_v23 = vpack.c.bf16 %v35_v22, %v34_v21  ;;  %v186_v26 = vpack.c.bf16 %v37_v25, %v36_v24  ;;  %v38_v27 = vld [vmem:[%s385_s1 + $0x80] sm:$0xff]  ;;  %v39_v28 = vld [vmem:[%s385_s1 + $0x88] sm:$0xff]  ;;  %v40_v30 = vld [vmem:[%s385_s1 + $0x90] sm:$0xff] }
   0x8   :  { %169 = vmatpush1.bf16.msra.mxu0 %v168_v6  ;;  %213 = vmatpush1.bf16.msra.mxu1 %v168_v6  ;;  %v189_v29 = vpack.c.bf16 %v39_v28, %v38_v27  ;;  %v41_v31 = vld [vmem:[%s385_s1 + $0x98] sm:$0xff]  ;;  %v42_v33 = vld [vmem:[%s385_s1 + $0xa0] sm:$0xff]  ;;  %v43_v34 = vld [vmem:[%s385_s1 + $0xa8] sm:$0xff] }
   0x9   :  { %170 = vmatprep.subr.bf16.mxu0 %v225_v0  ;;  %202 = vmatprep.subr.bf16.mxu1 %v225_v0  ;;  %v192_v32 = vpack.c.bf16 %v41_v31, %v40_v30  ;;  %v195_v35 = vpack.c.bf16 %v43_v34, %v42_v33  ;;  %v44_v36 = vld [vmem:[%s385_s1 + $0xb0] sm:$0xff]  ;;  %v45_v37 = vld [vmem:[%s385_s1 + $0xb8] sm:$0xff]  ;;  %v14_v39 = vld [vmem:[%s386_s0] sm:$0xff] }
   0xa   :  { %v198_v38 = vpack.c.bf16 %v45_v37, %v44_v36  ;;  %v18_v40 = vld [vmem:[%s386_s0 + $0x20] sm:$0xff]  ;;  %v17_v41 = vld [vmem:[%s386_s0 + $0x18] sm:$0xff]  ;;  %v16_v43 = vld [vmem:[%s386_s0 + $0x10] sm:$0xff] }
   0xb   :  { %v21_v42 = vld [vmem:[%s386_s0 + $0x38] sm:$0xff]  ;;  %v20_v44 = vld [vmem:[%s386_s0 + $0x30] sm:$0xff]  ;;  %v159_v45 = vld [vmem:[%s387_s2] ss:$0 sm:$0xff] }
   0xc   :  { %172 = vmatpush1.bf16.msra.mxu0 %v171_v9  ;;  %214 = vmatpush1.bf16.msra.mxu1 %v171_v9 }
   0xd   :  { %173 = vmatprep.subr.bf16.mxu0 %v225_v0  ;;  %203 = vmatprep.subr.bf16.mxu1 %v225_v0 }
  0x10   :  { %175 = vmatpush1.bf16.msra.mxu0 %v174_v14  ;;  %215 = vmatpush1.bf16.msra.mxu1 %v174_v14 }
  0x11   :  { %176 = vmatprep.subr.bf16.mxu0 %v225_v0  ;;  %204 = vmatprep.subr.bf16.mxu1 %v225_v0 }
  0x14   :  { %178 = vmatpush1.bf16.msra.mxu0 %v177_v17  ;;  %216 = vmatpush1.bf16.msra.mxu1 %v177_v17 }
  0x15   :  { %179 = vmatprep.subr.bf16.mxu0 %v225_v0  ;;  %205 = vmatprep.subr.bf16.mxu1 %v225_v0 }
  0x18   :  { %181 = vmatpush1.bf16.msra.mxu0 %v180_v20  ;;  %217 = vmatpush1.bf16.msra.mxu1 %v180_v20 }
  0x19   :  { %182 = vmatprep.subr.bf16.mxu0 %v225_v0  ;;  %206 = vmatprep.subr.bf16.mxu1 %v225_v0 }
  0x1c   :  { %184 = vmatpush1.bf16.msra.mxu0 %v183_v23  ;;  %218 = vmatpush1.bf16.msra.mxu1 %v183_v23 }
  0x1d   :  { %185 = vmatprep.subr.bf16.mxu0 %v225_v0  ;;  %207 = vmatprep.subr.bf16.mxu1 %v225_v0 }
  0x20   :  { %187 = vmatpush1.bf16.msra.mxu0 %v186_v26  ;;  %219 = vmatpush1.bf16.msra.mxu1 %v186_v26 }
  0x21   :  { %188 = vmatprep.subr.bf16.mxu0 %v225_v0  ;;  %208 = vmatprep.subr.bf16.mxu1 %v225_v0 }
  0x24   :  { %190 = vmatpush1.bf16.msra.mxu0 %v189_v29  ;;  %220 = vmatpush1.bf16.msra.mxu1 %v189_v29 }
  0x25   :  { %191 = vmatprep.subr.bf16.mxu0 %v225_v0  ;;  %209 = vmatprep.subr.bf16.mxu1 %v225_v0 }
  0x28   :  { %193 = vmatpush1.bf16.msra.mxu0 %v192_v32  ;;  %221 = vmatpush1.bf16.msra.mxu1 %v192_v32 }
  0x29   :  { %194 = vmatprep.subr.bf16.mxu0 %v225_v0  ;;  %210 = vmatprep.subr.bf16.mxu1 %v225_v0 }
  0x2c   :  { %196 = vmatpush1.bf16.msra.mxu0 %v195_v35  ;;  %222 = vmatpush1.bf16.msra.mxu1 %v195_v35 }
  0x2d   :  { %197 = vmatprep.subr.bf16.mxu0 %v225_v0  ;;  %211 = vmatprep.subr.bf16.mxu1 %v225_v0 }
  0x30   :  { %199 = vmatpush1.bf16.msra.mxu0 %v198_v38  ;;  %223 = vmatpush1.bf16.msra.mxu1 %v198_v38 }
  0x33   :  { %131 = vmatmul.mubr.f32.vlgmr.msra.gmra.mrb[0].mxu0 %v14_v39  ;;  %141 = vmatmul.mubr.f32.vlgmr.msra.gmra.mrb[0].mxu1 %v18_v40 }
  0x34   :  { %161 = vmatprep.mubr.msk.f32.mxu0 %vm53_vm0, %v17_v41  ;;  %163 = vmatprep.mubr.msk.f32.mxu1 %vm53_vm0, %v21_v42 }
  0x37   :  { %136 = vmatmul.mubr.f32.gmra.mrb[2].mxu0 %v16_v43  ;;  %146 = vmatmul.mubr.f32.gmra.mrb[2].mxu1 %v20_v44 }
 0x106   :  { %v132_v46 = vpop.f32.mrb[0].mxu0  ;;  %v142_v47 = vpop.f32.mrb[0].mxu1 }
 0x107   :  { %v133_v48 = vadd.f32 %v159_v45, %v132_v46  ;;  %v143_v49 = vadd.f32 %v159_v45, %v142_v47  ;;  %v134_v50 = vpop.f32.mrb[1].mxu0  ;;  %v144_v51 = vpop.f32.mrb[1].mxu1 }
 0x109   :  { %151 = vst [vmem:[%s388_s3] sm:$0xff] %v133_v48  ;;  %153 = vst [vmem:[%s388_s3 + $0x10] sm:$0xff] %v143_v49 }
 0x10a   :  { %v137_v52 = vpop.f32.mrb[2].mxu0  ;;  %v147_v53 = vpop.f32.mrb[2].mxu1 }
 0x10b   :  { %v138_v54 = vadd.f32 %v159_v45, %v137_v52  ;;  %v148_v55 = vadd.f32 %v159_v45, %v147_v53  ;;  %v139_v56 = vpop.f32.mrb[3].mxu0  ;;  %v149_v57 = vpop.f32.mrb[3].mxu1 }
 0x10d   :  { %152 = vst [vmem:[%s388_s3 + $0x8] sm:$0xff] %v138_v54  ;;  %154 = vst [vmem:[%s388_s3 + $0x18] sm:$0xff] %v148_v55 }

</bundles_post_ra>
